<compile_context>
chip_gen: v7x
topology: tpu7x:2x2x1
jax: 0.10.0
libtpu: 0.0.40
codegen_flags: <defaults>
</compile_context>

<pallas_src>
import math

import jax
import jax.numpy as jnp
import numpy as np
from jax.experimental import pallas as pl
from jax.experimental.pallas import tpu as pltpu


def _ceil_div(a, b):
    return -(-a // b)


# ----------------------------- Pallas kernel --------------------------------

def _zero_tofs_kernel(img_ref, keep_ref, out_ref):
    # keep_ref: (1, L) int32, 1 = keep, 0 = disabled TOF position.
    # where-select (not multiply) so NaN/Inf in disabled columns -> exactly 0.
    x = img_ref[...]
    out_ref[...] = jnp.where(keep_ref[...] != 0, x, jnp.zeros_like(x))


def _choose_lane_width(total, tof_count, cap=4096):
    """Lane-dense row width: multiple of lcm(T, 128), <= cap, preferring exact
    divisors of `total` so no padding copy is needed."""
    base = tof_count * (128 // math.gcd(tof_count, 128))  # lcm(T, 128)
    cap = max(base, (cap // base) * base)
    for lane_w in range(cap, base - 1, -base):
        if total % lane_w == 0:
            return lane_w
    return cap


def zero_disabled_tofs(img, keep_t, *, target_tile_bytes=2 * 1024 * 1024):
    """img: (N, T); keep_t: (T,) int32 (1 = keep, 0 = disabled TOF column)."""
    N, T = img.shape
    total = N * T
    itemsize = img.dtype.itemsize

    # ---- lane-dense relayout: flatten, fold into rows of L lanes ----
    L = _choose_lane_width(total, T)
    R = _ceil_div(total, L)
    flat = img.reshape(total)
    if R * L != total:
        flat = jnp.pad(flat, (0, R * L - total))
    img2d = flat.reshape(R, L)
    keep_row = jnp.tile(keep_t.astype(jnp.int32), L // T).reshape(1, L)

    # ---- block height: big (~2 MiB) tiles; keep >=2 grid steps when possible
    #      so both v7x TensorCores get work. 2 streams x 2 buffers x 2 MiB =
    #      ~8 MiB VMEM, safe on every generation without raising limits. ----
    if R <= 8:
        block_rows = R                        # full first dim (any R allowed)
    else:
        rows_budget = max(8, (target_tile_bytes // (L * itemsize) // 8) * 8)
        half = max(8, (((R + 1) // 2) // 8) * 8)
        block_rows = int(min(rows_budget, half))

    grid = (_ceil_div(R, block_rows),)

    out2d = pl.pallas_call(
        _zero_tofs_kernel,
        out_shape=jax.ShapeDtypeStruct((R, L), img.dtype),
        grid=grid,
        in_specs=[
            pl.BlockSpec((block_rows, L), lambda i: (i, 0)),
            pl.BlockSpec((1, L), lambda i: (0, 0)),
        ],
        out_specs=pl.BlockSpec((block_rows, L), lambda i: (i, 0)),
        input_output_aliases={0: 0},   # donate the relaid-out image buffer
        compiler_params=pltpu.CompilerParams(
            dimension_semantics=("parallel",)),
    )(img2d, keep_row)

    return out2d.reshape(R * L)[:total].reshape(N, T)


# --------------------- random disabled-TOF selection (glue) -----------------

def _select_disabled_tofs(key, tof_count, min_c, max_c, neighbor_p):
    """Returns keep mask of shape (tof_count,) int32: 0 where disabled, 1 kept."""
    k_count, k_init, k_perm, k_loop = jax.random.split(key, 4)
    count = jax.random.randint(k_count, (), min_c, max_c + 1)   # disabled_tofs_count
    initial = jax.random.randint(k_init, (), 0, tof_count).astype(jnp.int32)
    perm = jax.random.permutation(k_perm, tof_count).astype(jnp.int32)  # tof_list

    disabled = jnp.full((max_c,), -1, dtype=jnp.int32).at[0].set(initial)
    n = jnp.int32(1)  # how many entries of `disabled` are valid

    slots = jnp.arange(max_c, dtype=jnp.int32)

    def _in_disabled(vals, disabled, n):
        valid = (slots < n)[None, :]
        return jnp.any((vals[:, None] == disabled[None, :]) & valid, axis=1)

    def _first_from_perm(disabled, n):
        is_dis = _in_disabled(perm, disabled, n)
        idx = jnp.argmax(~is_dis)
        return perm[idx]

    for i in range(1, max_c):
        k_loop, k_r, k_p = jax.random.split(k_loop, 3)
        r = jax.random.uniform(k_r, ())
        porder = jax.random.permutation(k_p, max_c).astype(jnp.int32)

        def _first_offset_candidate(offset, disabled=disabled, n=n, porder=porder):
            cand = (disabled[porder] + offset) % tof_count
            valid_entry = porder < n                      # only real disabled entries
            cand_in_dis = _in_disabled(cand, disabled, n)
            ok = valid_entry & (~cand_in_dis)
            return cand[jnp.argmax(ok)], jnp.any(ok)

        neigh_val, neigh_found = _first_offset_candidate(1)
        opp_val, opp_found = _first_offset_candidate(tof_count // 2)
        fallback = _first_from_perm(disabled, n)

        use_neighbor = r < (neighbor_p / 2.0)
        use_opposite = (r >= (neighbor_p / 2.0)) & (r < neighbor_p)

        new_val = jnp.where(
            use_neighbor, neigh_val,
            jnp.where(use_opposite,
                      jnp.where(opp_found, opp_val, fallback),
                      fallback))
        # neighbour branch adds nothing if no free neighbour exists (as in torch)
        added = jnp.where(use_neighbor, neigh_found, True)

        active = (i < count) & added          # torch: loop runs (count - 1) times
        disabled = jnp.where(active, disabled.at[n].set(new_val), disabled)
        n = jnp.where(active, n + 1, n)

    t_idx = jnp.arange(tof_count, dtype=jnp.int32)
    is_disabled = _in_disabled(t_idx, disabled, n)
    keep = jnp.where(is_disabled, 0, 1).astype(jnp.int32)
    # torch: if disabled_tofs_count == 0 -> return unmodified copy
    keep = jnp.where(count == 0, jnp.ones_like(keep), keep)
    return keep


# ------------------------------- module wrapper ------------------------------

def disable_random_tofs(key, img,
                        min_disabled_tofs_count=1,
                        max_disabled_tofs_count=3,
                        neighbor_probability=0.5,
                        use_pallas=None):
    if min_disabled_tofs_count == 0 and max_disabled_tofs_count == 0:
        return img
    N, T = img.shape
    keep = _select_disabled_tofs(key, T,
                                 min_disabled_tofs_count,
                                 max_disabled_tofs_count,
                                 neighbor_probability)
    if use_pallas is None:
        # kernel-launch + pipeline overhead dominates for tiny images;
        # let XLA's fused elementwise handle those.
        use_pallas = (N * T * img.dtype.itemsize) >= (256 * 1024)
    if not use_pallas:
        return jnp.where(keep[None, :] != 0, img, jnp.zeros_like(img))
    return zero_disabled_tofs(img, keep)


# ----------------------------------- demo ------------------------------------

if __name__ == "__main__":
    key = jax.random.PRNGKey(0)
    k_img, k_aug = jax.random.split(key)

    N, T = 1024, 8   # 1024 samples x 8 TOF channels
    img = jax.random.normal(k_img, (N, T), dtype=jnp.float32)
    img_np = np.asarray(img)   # host snapshot (kernel donates its input buffer)

    out = disable_random_tofs(k_aug, img,
                              min_disabled_tofs_count=1,
                              max_disabled_tofs_count=3,
                              neighbor_probability=0.5,
                              use_pallas=True)   # force Pallas path at demo size
    out = jax.block_until_ready(out)
    out_np = np.asarray(out)

    # sanity: each TOF column is either untouched or exactly zeroed
    col_zero = np.all(out_np == 0.0, axis=0)
    col_same = np.all(out_np == img_np, axis=0)
    assert bool(np.all(col_zero | col_same))
    n_disabled = int(np.sum(col_zero & ~col_same))
    assert 1 <= n_disabled <= 3

    print("KERNEL_OK")
</pallas_src>

<mosaic_0001>
module attributes {stable_mosaic.version = 11 : i64} {
  func.func @_zero_tofs_kernel(%arg0: i32, %arg1: memref<2x4096xf32, #tpu.memory_space<vmem>>, %arg2: memref<1x4096xi32, #tpu.memory_space<vmem>>, %arg3: memref<2x4096xf32, #tpu.memory_space<vmem>>) attributes {dimension_semantics = [#tpu.dimension_semantics<parallel>], iteration_bounds = array<i64: 1>, scalar_prefetch = 0 : i64, scratch_operands = 0 : i64, tpu.core_type = #tpu.core_type<tc>, window_params = [{transform_indices = @transform_0, window_bounds = array<i64: 2, 4096>}, {pipeline_mode = #tpu.pipeline_mode<synchronous>, transform_indices = @transform_1, window_bounds = array<i64: 1, 4096>}, {transform_indices = @transform_2, window_bounds = array<i64: 2, 4096>}]} {
    %c0 = arith.constant 0 : index
    %c0_0 = arith.constant 0 : index
    %0 = vector.load %arg1[%c0, %c0_0] : memref<2x4096xf32, #tpu.memory_space<vmem>>, vector<2x4096xf32>
    %c0_1 = arith.constant 0 : index
    %c0_2 = arith.constant 0 : index
    %1 = vector.load %arg2[%c0_1, %c0_2] : memref<1x4096xi32, #tpu.memory_space<vmem>>, vector<1x4096xi32>
    %c0_i32 = arith.constant 0 : i32
    %2 = vector.broadcast %c0_i32 : i32 to vector<1x4096xi32>
    %3 = arith.cmpi ne, %1, %2 : vector<1x4096xi32>
    %cst = arith.constant 0.000000e+00 : f32
    %4 = vector.broadcast %cst : f32 to vector<2x4096xf32>
    %5 = vector.shape_cast %3 : vector<1x4096xi1> to vector<1x4096xi1>
    %6 = vector.broadcast %5 : vector<1x4096xi1> to vector<2x4096xi1>
    %7 = arith.select %6, %0, %4 : vector<2x4096xi1>, vector<2x4096xf32>
    %c0_3 = arith.constant 0 : index
    %c0_4 = arith.constant 0 : index
    %8 = vector.load %arg3[%c0_3, %c0_4] : memref<2x4096xf32, #tpu.memory_space<vmem>>, vector<2x4096xf32>
    tpu.vector_store %arg3[%c0_3, %c0_4], %7 {strides = array<i32>} : memref<2x4096xf32, #tpu.memory_space<vmem>>, vector<2x4096xf32>,
    return
  }
  func.func @transform_0(%arg0: i32) -> (i32, i32) {
    %c0_i32 = arith.constant 0 : i32
    %c0_i32_0 = arith.constant 0 : i32
    return %arg0, %c0_i32 : i32, i32
  }
  func.func @transform_1(%arg0: i32) -> (i32, i32) {
    %c0_i32 = arith.constant 0 : i32
    %c0_i32_0 = arith.constant 0 : i32
    %c0_i32_1 = arith.constant 0 : i32
    return %c0_i32, %c0_i32_0 : i32, i32
  }
  func.func @transform_2(%arg0: i32) -> (i32, i32) {
    %c0_i32 = arith.constant 0 : i32
    %c0_i32_0 = arith.constant 0 : i32
    return %arg0, %c0_i32 : i32, i32
  }
}

</mosaic_0001>

<bundles_post_ra>
// kernel: tpu_custom_call.1
= control target key start
LH: loop header
LB: loop body
LE: loop exit
PB: predicated region body
PF: predicated region fallthrough
CT: control target
= control target key end

     0   :  { %7 = vsyncpa [#allocation3], 0  ;;  %s915_s0 = inlined_call_operand.hbm [shape: f32[2,4096], index: 0, kind: input, shape index: {}, may-alias: {0,2}]   ;;  %s916_s1 = inlined_call_operand.vmem [shape: s32[1,4096], index: 1, kind: input, shape index: {}]   ;;  %s917_s2 = inlined_call_operand.hbm [shape: f32[2,4096], index: 2, kind: output, shape index: {}, may-alias: {0,2}]  }
   0x1   :  { %8 = vsyncpa [#allocation4], 0  ;;  %s671_s9 = smov [#allocation2]   ;;  %s623_s13 = scalar_lea.hbm %s915_s0, 1024 }
   0x2   :  { %s15_s10 = sshll.u32 %s671_s9, 4  ;;  %p624_p0 = scmp.ne.s32.totalorder %s915_s0, %s623_s13  ;;  %s16_s10 = int_to_ptr.vmem [resolvable:$true] %s15_s10 }
   0x3   :  { %p627_p1 = scmp.lt.u32.totalorder %s623_s13, %s915_s0 }
   0x5   :  { %p629_p2 = pnand %p627_p1, %p624_p0 }
   0x7   :  { %632 = shalt.err (!%p629_p2)
}
   0x8   :  { %s633_s18 = scalar_lea.vmem %s16_s10, 1024  ;;  %p638_p4 = scmp.lt.s32.totalorder %s16_s10, %s16_s10 }
   0x9   :  { %p634_p3 = scmp.ne.s32.totalorder %s16_s10, %s633_s18  ;;  %p639_p5 = scmp.lt.s32.totalorder %s633_s18, %s633_s18 }
   0xb   :  { %p640_p6 = por %p639_p5, %p638_p4 }
   0xd   :  { %p641_p7 = pnand %p640_p6, %p634_p3 }
   0xf   :  { %644 = shalt.err (!%p641_p7)
}
  0x10   :  { %18 = dma.hbm_to_vmem [thread:$0]  %s915_s0, 1024, %s16_s10, [#allocation3]  }
  0x11   :  { %667 = dma.done.wait [#allocation3], 1024  }
  0x12   :  { %668 = vsyncadd [#allocation3], 4294966272  ;;  %v44_v0 = vlaneseq  ;;  %v672_v1 = vmov 1983009808   ;;  %v24_v11 = vld [vmem:[#allocation2] sm:$0xff]  ;;  %v25_v13 = vld [vmem:[#allocation2 + $0x8] sm:$0xff] }
  0x13   :  { %v214_v2 = vunpack.c.l.s4 %v672_v1  ;;  %v32_v12 = vld [vmem:[%s916_s1] sm:$0xff]  ;;  %v212_v17 = vcombine.high %v24_v11, %v24_v11  ;;  %v229_v19 = vcombine.high %v25_v13, %v25_v13  ;;  %v26_v20 = vld [vmem:[#allocation2 + $0x10] sm:$0xff]  ;;  %v33_v21 = vld [vmem:[%s916_s1 + $0x8] sm:$0xff]  ;;  %v673_v22 = vmov 0  }
  0x14   :  { %v45_v3 = vshrl.u32 %v44_v0, 7  ;;  %vm36_vm0 = vcmp.ne.s32.totalorder %v32_v12, 0  ;;  %vm37_vm1 = vcmp.ne.s32.totalorder %v33_v21, 0  ;;  %v246_v25 = vcombine.high %v26_v20, %v26_v20  ;;  %v27_v12 = vld [vmem:[#allocation2 + $0x18] sm:$0xff] }
  0x15   :  { %v215_v4 = vunpack.c.0.s8 %v214_v2  ;;  %v40_v23 = vsel %vm36_vm0, 1, %v673_v22  ;;  %v41_v52 = vsel %vm37_vm1, 1, %v673_v22 }
  0x16   :  { %v702_v5 = vsub.s32 0, %v45_v3  ;;  %v706_v7 = vsub.s32 1, %v45_v3  ;;  %v708_v8 = vsub.s32 2, %v45_v3  ;;  %v710_v9 = vsub.s32 3, %v45_v3 }
  0x17   :  { %v704_v6 = vsub.s32 %v215_v4, %v45_v3  ;;  %v712_v10 = vsub.s32 4, %v45_v3  ;;  %v717_v14 = vsub.s32 5, %v45_v3  ;;  %v719_v15 = vsub.s32 6, %v45_v3 }
  0x18   :  { %v721_v16 = vsub.s32 7, %v45_v3  ;;  %v47_v26 = vrot.slane %v40_v23, %v702_v5  ;;  %v51_v27 = vrot.slane %v40_v23, %v706_v7  ;;  %v55_v28 = vrot.slane %v40_v23, %v708_v8 }
  0x19   :  { %v219_v18 = vrot.slane %v24_v11, %v704_v6  ;;  %v236_v24 = vrot.slane %v25_v13, %v704_v6  ;;  %v59_v29 = vrot.slane %v40_v23, %v710_v9  ;;  %v226_v30 = vrot.slane %v212_v17, %v704_v6 }
  0x1a   :  { %v63_v32 = vrot.slane %v40_v23, %v712_v10  ;;  %v67_v33 = vrot.slane %v40_v23, %v717_v14  ;;  %vm172_vm2 = vcmp.eq.s32.totalorder %v47_v26, 1  ;;  %vm173_vm3 = vcmp.eq.s32.totalorder %v51_v27, 1 }
  0x1b   :  { %v227_v31 = vcombine.high %v219_v18, %v219_v18  ;;  %vm174_vm4 = vcmp.eq.s32.totalorder %v55_v28, 1  ;;  %vm175_vm5 = vcmp.eq.s32.totalorder %v59_v29, 1  ;;  %v228_v34 = vcombine.high %v226_v30, %v226_v30 }
  0x1c   :  { %v380_v35 = vsel %vm172_vm2, %v219_v18, 0.0  ;;  %v382_v37 = vsel %vm174_vm4, %v226_v30, 0.0  ;;  %v71_v39 = vrot.slane %v40_v23, %v719_v15  ;;  %v75_v40 = vrot.slane %v40_v23, %v721_v16  ;;  %v28_v23 = vld [vmem:[#allocation2 + $0x20] sm:$0xff] }
  0x1d   :  { %v381_v36 = vsel %vm173_vm3, %v227_v31, 0.0  ;;  %vm176_vm6 = vcmp.eq.s32.totalorder %v63_v32, 1  ;;  %v383_v41 = vsel %vm175_vm5, %v228_v34, 0.0  ;;  %vm177_vm7 = vcmp.eq.s32.totalorder %v67_v33, 1 }
  0x1e   :  { %v444_v38 = vcombine.low %v380_v35, %v381_v36  ;;  %v243_v42 = vrot.slane %v229_v19, %v704_v6  ;;  %v244_v43 = vcombine.high %v236_v24, %v236_v24  ;;  %v445_v44 = vcombine.low %v382_v37, %v383_v41 }
  0x1f   :  { %vm178_vm8 = vcmp.eq.s32.totalorder %v71_v39, 1  ;;  %vm179_vm9 = vcmp.eq.s32.totalorder %v75_v40, 1  ;;  %v384_v47 = vsel %vm176_vm6, %v236_v24, 0.0  ;;  %v253_v53 = vrot.slane %v26_v20, %v704_v6  ;;  %v34_v24 = vld [vmem:[%s916_s1 + $0x10] sm:$0xff] }
  0x20   :  { %v452_v45 = vrot.slane %v444_v38, %v704_v6  ;;  %v245_v46 = vcombine.high %v243_v42, %v243_v42  ;;  %v385_v48 = vsel %vm177_vm7, %v244_v43, 0.0  ;;  %v386_v49 = vsel %vm178_vm8, %v243_v42, 0.0 }
  0x21   :  { %v459_v50 = vrot.slane %v445_v44, %v704_v6  ;;  %v461_v51 = vcombine.low %v384_v47, %v385_v48  ;;  %v79_v55 = vrot.slane %v41_v52, %v702_v5  ;;  %v83_v56 = vrot.slane %v41_v52, %v706_v7 }
  0x22   :  { %v387_v54 = vsel %vm179_vm9, %v245_v46, 0.0  ;;  %v87_v57 = vrot.slane %v41_v52, %v708_v8  ;;  %v91_v61 = vrot.slane %v41_v52, %v710_v9  ;;  %v260_v0 = vrot.slane %v246_v25, %v704_v6 }
  0x23   :  { %v460_v58 = vcombine.low %v452_v45, %v459_v50  ;;  %v462_v59 = vcombine.low %v386_v49, %v387_v54  ;;  %v469_v60 = vrot.slane %v461_v51, %v704_v6  ;;  %vm749_vm10 = vcmp.eq.s32.totalorder %v79_v55, 1 }
  0x24   :  { %vm181_vm11 = vcmp.eq.s32.totalorder %v83_v56, 1  ;;  %vm753_vm12 = vcmp.eq.s32.totalorder %v87_v57, 1  ;;  %vm183_vm13 = vcmp.eq.s32.totalorder %v91_v61, 1  ;;  %v261_v2 = vcombine.high %v253_v53, %v253_v53 }
  0x25   :  { %588 = vst [vmem:[#allocation5] sm:$0xff] %v460_v58  ;;  %v476_v1 = vrot.slane %v462_v59, %v704_v6  ;;  %v388_v3 = vsel %vm749_vm10, %v253_v53, 0.0  ;;  %v262_v4 = vcombine.high %v260_v0, %v260_v0  ;;  %v390_v11 = vsel %vm753_vm12, %v260_v0, 0.0  ;;  %v29_v0 = vld [vmem:[#allocation2 + $0x28] sm:$0xff] }
  0x26   :  { %v95_v13 = vrot.slane %v41_v52, %v712_v10  ;;  %v99_v17 = vrot.slane %v41_v52, %v717_v14  ;;  %v389_v19 = vsel %vm181_vm11, %v261_v2, 0.0  ;;  %v103_v20 = vrot.slane %v41_v52, %v719_v15 }
  0x27   :  { %v477_v18 = vcombine.low %v469_v60, %v476_v1  ;;  %v107_v21 = vrot.slane %v41_v52, %v721_v16  ;;  %v391_v25 = vsel %vm183_vm13, %v262_v4, 0.0  ;;  %v478_v26 = vcombine.low %v388_v3, %v389_v19 }
  0x28   :  { %vm770_vm14 = vcmp.eq.s32.totalorder %v95_v13, 1  ;;  %vm774_vm15 = vcmp.eq.s32.totalorder %v99_v17, 1  ;;  %v479_v29 = vcombine.low %v390_v11, %v391_v25  ;;  %vm778_vm0 = vcmp.eq.s32.totalorder %v103_v20, 1  ;;  %v30_v13 = vld [vmem:[#allocation2 + $0x30] sm:$0xff]  ;;  %v35_v17 = vld [vmem:[%s916_s1 + $0x18] sm:$0xff]  ;;  %s674_s1 = smov [#allocation5]  }
  0x29   :  { %589 = vst [vmem:[#allocation5 + $0x8] sm:$0xff] %v477_v18  ;;  %vm782_vm1 = vcmp.eq.s32.totalorder %v107_v21, 1  ;;  %v263_v32 = vcombine.high %v27_v12, %v27_v12  ;;  %v486_v33 = vrot.slane %v478_v26, %v704_v6  ;;  %v270_v34 = vrot.slane %v27_v12, %v704_v6  ;;  %s602_s28 = sshll.u32 %s674_s1, 4  ;;  %s603_s28 = int_to_ptr.vmem [resolvable:$true] %s602_s28 }
  0x2a   :  { %vm38_vm2 = vcmp.ne.s32.totalorder %v34_v24, 0  ;;  %v280_v35 = vcombine.high %v28_v23, %v28_v23  ;;  %v493_v36 = vrot.slane %v479_v29, %v704_v6  ;;  %v287_v39 = vrot.slane %v28_v23, %v704_v6  ;;  %s645_s29 = scalar_lea.vmem %s603_s28, 1024  ;;  %p650_p9 = scmp.lt.s32.totalorder %s603_s28, %s603_s28 }
  0x2b   :  { %v277_v37 = vrot.slane %v263_v32, %v704_v6  ;;  %v42_v38 = vsel %vm38_vm2, 1, %v673_v22  ;;  %v278_v40 = vcombine.high %v270_v34, %v270_v34  ;;  %v392_v41 = vsel %vm770_vm14, %v270_v34, 0.0  ;;  %p646_p8 = scmp.ne.s32.totalorder %s603_s28, %s645_s29  ;;  %p651_p10 = scmp.lt.s32.totalorder %s645_s29, %s645_s29 }
  0x2c   :  { %v111_v42 = vrot.slane %v42_v38, %v702_v5  ;;  %v115_v43 = vrot.slane %v42_v38, %v706_v7  ;;  %v494_v44 = vcombine.low %v486_v33, %v493_v36  ;;  %v119_v47 = vrot.slane %v42_v38, %v708_v8 }
  0x2d   :  { %v279_v45 = vcombine.high %v277_v37, %v277_v37  ;;  %v394_v46 = vsel %vm778_vm0, %v277_v37, 0.0  ;;  %v393_v48 = vsel %vm774_vm15, %v278_v40, 0.0  ;;  %v123_v49 = vrot.slane %v42_v38, %v710_v9  ;;  %p652_p11 = por %p651_p10, %p650_p9 }
  0x2e   :  { %vm802_vm3 = vcmp.eq.s32.totalorder %v111_v42, 1  ;;  %vm189_vm4 = vcmp.eq.s32.totalorder %v115_v43, 1  ;;  %590 = vst [vmem:[#allocation5 + $0x10] sm:$0xff] %v494_v44  ;;  %v495_v52 = vcombine.low %v392_v41, %v393_v48  ;;  %vm808_vm5 = vcmp.eq.s32.totalorder %v119_v47, 1  ;;  %v31_v47 = vld [vmem:[#allocation2 + $0x38] sm:$0xff] }
  0x2f   :  { %v395_v51 = vsel %vm782_vm1, %v279_v45, 0.0  ;;  %v294_v54 = vrot.slane %v280_v35, %v704_v6  ;;  %vm191_vm6 = vcmp.eq.s32.totalorder %v123_v49, 1  ;;  %v295_v56 = vcombine.high %v287_v39, %v287_v39  ;;  %p653_p12 = pnand %p652_p11, %p646_p8 }
  0x30   :  { %v496_v55 = vcombine.low %v394_v46, %v395_v51  ;;  %v396_v57 = vsel %vm802_vm3, %v287_v39, 0.0  ;;  %v503_v58 = vrot.slane %v495_v52, %v704_v6  ;;  %v127_v61 = vrot.slane %v42_v38, %v712_v10 }
  0x31   :  { %v296_v59 = vcombine.high %v294_v54, %v294_v54  ;;  %v398_v60 = vsel %vm808_vm5, %v294_v54, 0.0  ;;  %v397_v63 = vsel %vm189_vm4, %v295_v56, 0.0  ;;  %v131_v1 = vrot.slane %v42_v38, %v717_v14 }
  0x32   :  { %v510_v62 = vrot.slane %v496_v55, %v704_v6  ;;  %v135_v2 = vrot.slane %v42_v38, %v719_v15  ;;  %v512_v4 = vcombine.low %v396_v57, %v397_v63  ;;  %v139_v11 = vrot.slane %v42_v38, %v721_v16 }
  0x33   :  { %v399_v3 = vsel %vm191_vm6, %v296_v59, 0.0  ;;  %vm823_vm7 = vcmp.eq.s32.totalorder %v127_v61, 1  ;;  %vm830_vm8 = vcmp.eq.s32.totalorder %v131_v1, 1  ;;  %v297_v25 = vcombine.high %v29_v0, %v29_v0 }
  0x34   :  { %v511_v18 = vcombine.low %v503_v58, %v510_v62  ;;  %v513_v19 = vcombine.low %v398_v60, %v399_v3  ;;  %vm834_vm9 = vcmp.eq.s32.totalorder %v135_v2, 1  ;;  %v520_v23 = vrot.slane %v512_v4, %v704_v6 }
  0x35   :  { %vm839_vm10 = vcmp.eq.s32.totalorder %v139_v11, 1  ;;  %v304_v26 = vrot.slane %v29_v0, %v704_v6  ;;  %vm39_vm11 = vcmp.ne.s32.totalorder %v35_v17, 0  ;;  %v314_v28 = vcombine.high %v30_v13, %v30_v13 }
  0x36   :  { %591 = vst [vmem:[#allocation5 + $0x18] sm:$0xff] %v511_v18  ;;  %v527_v27 = vrot.slane %v513_v19, %v704_v6  ;;  %v321_v29 = vrot.slane %v30_v13, %v704_v6  ;;  %v311_v30 = vrot.slane %v297_v25, %v704_v6  ;;  %v43_v33 = vsel %vm39_vm11, 1, %v673_v22 }
  0x37   :  { %v312_v31 = vcombine.high %v304_v26, %v304_v26  ;;  %v400_v32 = vsel %vm823_vm7, %v304_v26, 0.0  ;;  %v143_v35 = vrot.slane %v43_v33, %v702_v5  ;;  %v147_v36 = vrot.slane %v43_v33, %v706_v7 }
  0x38   :  { %v528_v34 = vcombine.low %v520_v23, %v527_v27  ;;  %v151_v37 = vrot.slane %v43_v33, %v708_v8  ;;  %v313_v38 = vcombine.high %v311_v30, %v311_v30  ;;  %v402_v40 = vsel %vm834_vm9, %v311_v30, 0.0 }
  0x39   :  { %v401_v39 = vsel %vm830_vm8, %v312_v31, 0.0  ;;  %v155_v41 = vrot.slane %v43_v33, %v710_v9  ;;  %vm858_vm12 = vcmp.eq.s32.totalorder %v143_v35, 1  ;;  %vm197_vm13 = vcmp.eq.s32.totalorder %v147_v36, 1 }
  0x3a   :  { %592 = vst [vmem:[#allocation5 + $0x20] sm:$0xff] %v528_v34  ;;  %v529_v42 = vcombine.low %v400_v32, %v401_v39  ;;  %vm862_vm14 = vcmp.eq.s32.totalorder %v151_v37, 1  ;;  %v403_v7 = vsel %vm839_vm10, %v313_v38, 0.0  ;;  %v328_v9 = vrot.slane %v314_v28, %v704_v6 }
  0x3b   :  { %vm868_vm15 = vcmp.eq.s32.totalorder %v155_v41, 1  ;;  %v329_v43 = vcombine.high %v321_v29, %v321_v29  ;;  %v530_v44 = vcombine.low %v402_v40, %v403_v7  ;;  %v404_v46 = vsel %vm858_vm12, %v321_v29, 0.0 }
  0x3c   :  { %v537_v45 = vrot.slane %v529_v42, %v704_v6  ;;  %v159_v48 = vrot.slane %v43_v33, %v712_v10  ;;  %v330_v49 = vcombine.high %v328_v9, %v328_v9  ;;  %v406_v51 = vsel %vm862_vm14, %v328_v9, 0.0 }
  0x3d   :  { %v405_v50 = vsel %vm197_vm13, %v329_v43, 0.0  ;;  %v163_v52 = vrot.slane %v43_v33, %v717_v14  ;;  %v544_v53 = vrot.slane %v530_v44, %v704_v6  ;;  %v167_v55 = vrot.slane %v43_v33, %v719_v15 }
  0x3e   :  { %v546_v54 = vcombine.low %v404_v46, %v405_v50  ;;  %v171_v56 = vrot.slane %v43_v33, %v721_v16  ;;  %v407_v57 = vsel %vm868_vm15, %v330_v49, 0.0  ;;  %vm885_vm0 = vcmp.eq.s32.totalorder %v159_v48, 1 }
  0x3f   :  { %v331_v10 = vcombine.high %v31_v47, %v31_v47  ;;  %v545_v59 = vcombine.low %v537_v45, %v544_v53  ;;  %v547_v60 = vcombine.low %v406_v51, %v407_v57  ;;  %vm890_vm1 = vcmp.eq.s32.totalorder %v167_v55, 1 }
  0x40   :  { %v554_v61 = vrot.slane %v546_v54, %v704_v6  ;;  %v338_v15 = vrot.slane %v31_v47, %v704_v6  ;;  %vm201_vm2 = vcmp.eq.s32.totalorder %v163_v52, 1  ;;  %vm203_vm3 = vcmp.eq.s32.totalorder %v171_v56, 1 }
  0x41   :  { %v345_v16 = vrot.slane %v331_v10, %v704_v6  ;;  %593 = vst [vmem:[#allocation5 + $0x28] sm:$0xff] %v545_v59  ;;  %v561_v62 = vrot.slane %v547_v60, %v704_v6 }
  0x42   :  { %v346_v63 = vcombine.high %v338_v15, %v338_v15  ;;  %v408_v1 = vsel %vm885_vm0, %v338_v15, 0.0 }
  0x43   :  { %v347_v0 = vcombine.high %v345_v16, %v345_v16  ;;  %v410_v2 = vsel %vm890_vm1, %v345_v16, 0.0  ;;  %v562_v3 = vcombine.low %v554_v61, %v561_v62 }
  0x44   :  { %v409_v4 = vsel %vm201_vm2, %v346_v63, 0.0 }
  0x45   :  { %v411_v11 = vsel %vm203_vm3, %v347_v0, 0.0  ;;  %594 = vst [vmem:[#allocation5 + $0x30] sm:$0xff] %v562_v3  ;;  %v563_v12 = vcombine.low %v408_v1, %v409_v4 }
  0x46   :  { %v564_v13 = vcombine.low %v410_v2, %v411_v11 }
  0x47   :  { %v571_v17 = vrot.slane %v563_v12, %v704_v6 }
  0x48   :  { %v578_v18 = vrot.slane %v564_v13, %v704_v6 }
  0x4a   :  { %v579_v19 = vcombine.low %v571_v17, %v578_v18 }
  0x4c   :  { %595 = vst [vmem:[#allocation5 + $0x38] sm:$0xff] %v579_v19 }
  0x4d   :  { %656 = shalt.err (!%p653_p12)
}
  0x4e   :  { %s657_s4 = scalar_lea.hbm %s917_s2, 1024 }
  0x4f   :  { %p658_p13 = scmp.ne.s32.totalorder %s917_s2, %s657_s4  ;;  %p661_p0 = scmp.lt.u32.totalorder %s657_s4, %s917_s2 }
  0x51   :  { %p663_p1 = pnand %p661_p0, %p658_p13 }
  0x53   :  { %666 = shalt.err (!%p663_p1)
}
  0x54   :  { %605 = dma.vmem_to_hbm [thread:$0]  %s603_s28, 1024, %s917_s2, [#allocation4]  }
  0x55   :  { %669 = dma.done.wait [#allocation4], 1024  }
  0x56   :  { %670 = vsyncadd [#allocation4], 4294966272 }
  0x57   :  { %609 = vsyncpa [#allocation3], 1 }
  0x58   :  { %610 = vsyncpa [#allocation4], 1 }

</bundles_post_ra>
